<compile_context>
chip_gen: v7x
topology: tpu7x:2x2x1
jax: 0.10.0
libtpu: 0.0.40
codegen_flags: <defaults>
</compile_context>

<pallas_src>
import functools

import jax
import jax.numpy as jnp
from jax.experimental import pallas as pl
from jax.experimental.pallas import tpu as pltpu


def _convplus_kernel(x_ref, w_ref, b_ref, o_ref, patch_ref, *, H, W, cin, cout, offsets):
    """Fused cross-conv: im2col into a VMEM scratch, one MXU matmul, bias, store."""
    x = x_ref[0]                                           # (H, W, cin)
    n_tap = len(offsets)

    # Zero-init: the slots that are never overwritten below are exactly the
    # zero-padding (halo) contributions of the convolution.
    patch_ref[...] = jnp.zeros((H, W, n_tap * cin), jnp.float32)

    # Scatter each shifted tap into its K-slot of the im2col patch (all slices static).
    for t, (oy, ox) in enumerate(offsets):
        dh0, dh1 = max(0, -oy), H - max(0, oy)             # destination (output) window
        dw0, dw1 = max(0, -ox), W - max(0, ox)
        sh0, sh1 = max(0, oy), H - max(0, -oy)             # source (input) window
        sw0, sw1 = max(0, ox), W - max(0, -ox)
        patch_ref[dh0:dh1, dw0:dw1, t * cin:(t + 1) * cin] = x[sh0:sh1, sw0:sw1, :]

    # Single matmul with K = n_tap*cin instead of 2k tiny K=cin dots.
    patch = patch_ref[...].reshape(H * W, n_tap * cin)
    y = jnp.dot(patch, w_ref[...], preferred_element_type=jnp.float32)
    y = y + b_ref[...]                                     # (1, cout): b1 + b2
    o_ref[0] = y.reshape(H, W, cout)


def conv_plus(x_nchw, w1_oihw, b1, w2_oihw, b2, k=3):
    """ConvPlus forward. Weights in PyTorch layout:
       w1_oihw: (c2, c1, k, 1)   -- the (k,1) conv
       w2_oihw: (c2, c1, 1, k)   -- the (1,k) conv
       biases:  (c2,)."""
    N, C1, H, W = x_nchw.shape
    C2 = w1_oihw.shape[0]
    assert k % 2 == 1
    p = k // 2

    # NCHW -> NHWC so channels sit on the lane axis.
    x = jnp.transpose(x_nchw, (0, 2, 3, 1)).astype(jnp.float32)

    # Per-tap (c1, c2) matrices.
    w1 = jnp.transpose(w1_oihw[:, :, :, 0], (2, 1, 0))     # (k, c1, c2), vertical taps
    w2 = jnp.transpose(w2_oihw[:, :, 0, :], (2, 1, 0))     # (k, c1, c2), horizontal taps

    # Fold both convs into one cross stencil: 2k-1 taps (shared center), bias b1+b2.
    offsets, pieces = [], []
    for i in range(k):
        if i == p:
            continue
        offsets.append((i - p, 0))          # vertical offset, weight w1[i]
        pieces.append(w1[i])
    offsets.append((0, 0))                  # merged center tap
    pieces.append(w1[p] + w2[p])
    for i in range(k):
        if i == p:
            continue
        offsets.append((0, i - p))          # horizontal offset, weight w2[i]
        pieces.append(w2[i])
    n_tap = len(offsets)

    w_comb = jnp.concatenate(pieces, axis=0).astype(jnp.float32)   # (n_tap*c1, c2)
    b_comb = (b1 + b2).reshape(1, C2).astype(jnp.float32)

    kern = functools.partial(_convplus_kernel, H=H, W=W, cin=C1, cout=C2,
                             offsets=tuple(offsets))

    out_nhwc = pl.pallas_call(
        kern,
        out_shape=jax.ShapeDtypeStruct((N, H, W, C2), jnp.float32),
        grid=(N,),
        in_specs=[
            pl.BlockSpec((1, H, W, C1), lambda n: (n, 0, 0, 0)),
            pl.BlockSpec((n_tap * C1, C2), lambda n: (0, 0)),   # weights resident in VMEM
            pl.BlockSpec((1, C2), lambda n: (0, 0)),            # combined bias
        ],
        out_specs=pl.BlockSpec((1, H, W, C2), lambda n: (n, 0, 0, 0)),
        scratch_shapes=[pltpu.VMEM((H, W, n_tap * C1), jnp.float32)],  # im2col scratch
        compiler_params=pltpu.CompilerParams(dimension_semantics=("parallel",)),
    )(x, w_comb, b_comb)

    return jnp.transpose(out_nhwc, (0, 3, 1, 2))           # back to NCHW


def conv_plus_reference(x, w1_oihw, b1, w2_oihw, b2, k=3):
    """Pure-JAX reference (lax.conv) matching the PyTorch module semantics."""
    p = k // 2
    dn = ('NCHW', 'OIHW', 'NCHW')
    y1 = jax.lax.conv_general_dilated(x, w1_oihw, (1, 1), ((p, p), (0, 0)),
                                      dimension_numbers=dn)
    y2 = jax.lax.conv_general_dilated(x, w2_oihw, (1, 1), ((0, 0), (p, p)),
                                      dimension_numbers=dn)
    return y1 + b1[None, :, None, None] + y2 + b2[None, :, None, None]


if __name__ == "__main__":
    key = jax.random.PRNGKey(0)
    k_x, k_w1, k_b1, k_w2, k_b2 = jax.random.split(key, 5)

    N, C1, H, W = 2, 4, 16, 16
    C2, K = 8, 3

    x = jax.random.normal(k_x, (N, C1, H, W), jnp.float32)
    w1 = 0.2 * jax.random.normal(k_w1, (C2, C1, K, 1), jnp.float32)
    b1 = 0.1 * jax.random.normal(k_b1, (C2,), jnp.float32)
    w2 = 0.2 * jax.random.normal(k_w2, (C2, C1, 1, K), jnp.float32)
    b2 = 0.1 * jax.random.normal(k_b2, (C2,), jnp.float32)

    out = conv_plus(x, w1, b1, w2, b2, k=K)
    out = jax.block_until_ready(out)
    assert out.shape == (N, C2, H, W), out.shape

    ref = conv_plus_reference(x, w1, b1, w2, b2, k=K)
    max_err = float(jnp.max(jnp.abs(out - ref)))
    if max_err > 1e-2:
        raise AssertionError(f"mismatch vs lax.conv reference: max abs err {max_err}")

    print("KERNEL_OK")
</pallas_src>

<mosaic_0001>
module attributes {stable_mosaic.version = 11 : i64} {
  func.func @_convplus_kernel(%arg0: i32, %arg1: memref<1x16x16x4xf32, #tpu.memory_space<vmem>>, %arg2: memref<20x8xf32, #tpu.memory_space<vmem>>, %arg3: memref<1x8xf32, #tpu.memory_space<vmem>>, %arg4: memref<1x16x16x8xf32, #tpu.memory_space<vmem>>, %arg5: memref<16x16x20xf32, #tpu.memory_space<vmem>>) attributes {dimension_semantics = [#tpu.dimension_semantics<parallel>], iteration_bounds = array<i64: 2>, scalar_prefetch = 0 : i64, scratch_operands = 1 : i64, tpu.core_type = #tpu.core_type<tc>, window_params = [{transform_indices = @transform_0, window_bounds = array<i64: 1, 16, 16, 4>}, {pipeline_mode = #tpu.pipeline_mode<synchronous>, transform_indices = @transform_1, window_bounds = array<i64: 20, 8>}, {pipeline_mode = #tpu.pipeline_mode<synchronous>, transform_indices = @transform_2, window_bounds = array<i64: 1, 8>}, {transform_indices = @transform_3, window_bounds = array<i64: 1, 16, 16, 8>}]} {
    %c0 = arith.constant 0 : index
    %c0_0 = arith.constant 0 : index
    %c0_1 = arith.constant 0 : index
    %c0_2 = arith.constant 0 : index
    %0 = vector.load %arg1[%c0, %c0_0, %c0_1, %c0_2] : memref<1x16x16x4xf32, #tpu.memory_space<vmem>>, vector<1x16x16x4xf32>
    %1 = vector.shape_cast %0 : vector<1x16x16x4xf32> to vector<16x16x4xf32>
    %cst = arith.constant 0.000000e+00 : f32
    %2 = vector.broadcast %cst : f32 to vector<16x16x20xf32>
    %c0_3 = arith.constant 0 : index
    %c0_4 = arith.constant 0 : index
    %c0_5 = arith.constant 0 : index
    %3 = vector.load %arg5[%c0_3, %c0_4, %c0_5] : memref<16x16x20xf32, #tpu.memory_space<vmem>>, vector<16x16x20xf32>
    tpu.vector_store %arg5[%c0_3, %c0_4, %c0_5], %2 {strides = array<i32>} : memref<16x16x20xf32, #tpu.memory_space<vmem>>, vector<16x16x20xf32>,
    %4 = vector.extract_strided_slice %1 {offsets = [0, 0, 0], sizes = [15, 16, 4], strides = [1, 1, 1]} : vector<16x16x4xf32> to vector<15x16x4xf32>
    %c1 = arith.constant 1 : index
    %c0_6 = arith.constant 0 : index
    %c0_7 = arith.constant 0 : index
    %5 = vector.load %arg5[%c1, %c0_6, %c0_7] : memref<16x16x20xf32, #tpu.memory_space<vmem>>, vector<15x16x4xf32>
    tpu.vector_store %arg5[%c1, %c0_6, %c0_7], %4 {strides = array<i32>} : memref<16x16x20xf32, #tpu.memory_space<vmem>>, vector<15x16x4xf32>,
    %6 = vector.extract_strided_slice %1 {offsets = [1, 0, 0], sizes = [15, 16, 4], strides = [1, 1, 1]} : vector<16x16x4xf32> to vector<15x16x4xf32>
    %c0_8 = arith.constant 0 : index
    %c0_9 = arith.constant 0 : index
    %c4 = arith.constant 4 : index
    %7 = vector.load %arg5[%c0_8, %c0_9, %c4] : memref<16x16x20xf32, #tpu.memory_space<vmem>>, vector<15x16x4xf32>
    tpu.vector_store %arg5[%c0_8, %c0_9, %c4], %6 {strides = array<i32>} : memref<16x16x20xf32, #tpu.memory_space<vmem>>, vector<15x16x4xf32>,
    %c0_10 = arith.constant 0 : index
    %c0_11 = arith.constant 0 : index
    %c8 = arith.constant 8 : index
    %8 = vector.load %arg5[%c0_10, %c0_11, %c8] : memref<16x16x20xf32, #tpu.memory_space<vmem>>, vector<16x16x4xf32>
    tpu.vector_store %arg5[%c0_10, %c0_11, %c8], %1 {strides = array<i32>} : memref<16x16x20xf32, #tpu.memory_space<vmem>>, vector<16x16x4xf32>,
    %9 = vector.extract_strided_slice %1 {offsets = [0, 0, 0], sizes = [16, 15, 4], strides = [1, 1, 1]} : vector<16x16x4xf32> to vector<16x15x4xf32>
    %c0_12 = arith.constant 0 : index
    %c1_13 = arith.constant 1 : index
    %c12 = arith.constant 12 : index
    %10 = vector.load %arg5[%c0_12, %c1_13, %c12] : memref<16x16x20xf32, #tpu.memory_space<vmem>>, vector<16x15x4xf32>
    tpu.vector_store %arg5[%c0_12, %c1_13, %c12], %9 {strides = array<i32>} : memref<16x16x20xf32, #tpu.memory_space<vmem>>, vector<16x15x4xf32>,
    %11 = vector.extract_strided_slice %1 {offsets = [0, 1, 0], sizes = [16, 15, 4], strides = [1, 1, 1]} : vector<16x16x4xf32> to vector<16x15x4xf32>
    %c0_14 = arith.constant 0 : index
    %c0_15 = arith.constant 0 : index
    %c16 = arith.constant 16 : index
    %12 = vector.load %arg5[%c0_14, %c0_15, %c16] : memref<16x16x20xf32, #tpu.memory_space<vmem>>, vector<16x15x4xf32>
    tpu.vector_store %arg5[%c0_14, %c0_15, %c16], %11 {strides = array<i32>} : memref<16x16x20xf32, #tpu.memory_space<vmem>>, vector<16x15x4xf32>,
    %c0_16 = arith.constant 0 : index
    %c0_17 = arith.constant 0 : index
    %c0_18 = arith.constant 0 : index
    %13 = vector.load %arg5[%c0_16, %c0_17, %c0_18] : memref<16x16x20xf32, #tpu.memory_space<vmem>>, vector<16x16x20xf32>
    %14 = vector.shape_cast %13 : vector<16x16x20xf32> to vector<256x20xf32>
    %c0_19 = arith.constant 0 : index
    %c0_20 = arith.constant 0 : index
    %15 = vector.load %arg2[%c0_19, %c0_20] : memref<20x8xf32, #tpu.memory_space<vmem>>, vector<20x8xf32>
    %cst_21 = arith.constant dense<0.000000e+00> : vector<256x8xf32>
    %16 = tpu.matmul %14, %15, %cst_21 {dimension_numbers = #tpu.dot_dimension_numbers<[1], [0], [0], [1], [0, 0, 1, 1], [], []>} : vector<256x20xf32>, vector<20x8xf32>, vector<256x8xf32> -> vector<256x8xf32>
    %c0_22 = arith.constant 0 : index
    %c0_23 = arith.constant 0 : index
    %17 = vector.load %arg3[%c0_22, %c0_23] : memref<1x8xf32, #tpu.memory_space<vmem>>, vector<1x8xf32>
    %18 = vector.broadcast %17 : vector<1x8xf32> to vector<256x8xf32>
    %19 = arith.addf %16, %18 : vector<256x8xf32>
    %20 = vector.shape_cast %19 : vector<256x8xf32> to vector<16x16x8xf32>
    %c0_24 = arith.constant 0 : index
    %c0_25 = arith.constant 0 : index
    %c0_26 = arith.constant 0 : index
    %c0_27 = arith.constant 0 : index
    %21 = vector.load %arg4[%c0_24, %c0_25, %c0_26, %c0_27] : memref<1x16x16x8xf32, #tpu.memory_space<vmem>>, vector<1x16x16x8xf32>
    %22 = vector.shape_cast %21 : vector<1x16x16x8xf32> to vector<16x16x8xf32>
    %23 = vector.shape_cast %20 : vector<16x16x8xf32> to vector<1x16x16x8xf32>
    tpu.vector_store %arg4[%c0_24, %c0_25, %c0_26, %c0_27], %23 {strides = array<i32>} : memref<1x16x16x8xf32, #tpu.memory_space<vmem>>, vector<1x16x16x8xf32>,
    return
  }
  func.func @transform_0(%arg0: i32) -> (i32, i32, i32, i32) {
    %c0_i32 = arith.constant 0 : i32
    %c0_i32_0 = arith.constant 0 : i32
    %c0_i32_1 = arith.constant 0 : i32
    %c0_i32_2 = arith.constant 0 : i32
    return %arg0, %c0_i32, %c0_i32_0, %c0_i32_1 : i32, i32, i32, i32
  }
  func.func @transform_1(%arg0: i32) -> (i32, i32) {
    %c0_i32 = arith.constant 0 : i32
    %c0_i32_0 = arith.constant 0 : i32
    %c0_i32_1 = arith.constant 0 : i32
    return %c0_i32, %c0_i32_0 : i32, i32
  }
  func.func @transform_2(%arg0: i32) -> (i32, i32) {
    %c0_i32 = arith.constant 0 : i32
    %c0_i32_0 = arith.constant 0 : i32
    %c0_i32_1 = arith.constant 0 : i32
    return %c0_i32, %c0_i32_0 : i32, i32
  }
  func.func @transform_3(%arg0: i32) -> (i32, i32, i32, i32) {
    %c0_i32 = arith.constant 0 : i32
    %c0_i32_0 = arith.constant 0 : i32
    %c0_i32_1 = arith.constant 0 : i32
    %c0_i32_2 = arith.constant 0 : i32
    return %arg0, %c0_i32, %c0_i32_0, %c0_i32_1 : i32, i32, i32, i32
  }
}

</mosaic_0001>

<bundles_post_ra>
// kernel: tpu_custom_call.1
= control target key start
LH: loop header
LB: loop body
LE: loop exit
PB: predicated region body
PF: predicated region fallthrough
CT: control target
= control target key end

     0   :  { %s1455_s12 = smov 0   ;;  %s2201_s0 = inlined_call_operand.vmem [shape: f32[2,16,16,4], index: 0, kind: input, shape index: {}]   ;;  %s2202_s1 = inlined_call_operand.vmem [shape: f32[20,8], index: 1, kind: input, shape index: {}]   ;;  %s2203_s2 = inlined_call_operand.vmem [shape: f32[1,8], index: 2, kind: input, shape index: {}]   ;;  %s2204_s3 = inlined_call_operand.vmem [shape: f32[2,16,16,8], index: 3, kind: output, shape index: {}]  }
   0x1 LB: > { %s1265_s13 = sadd.s32 4294967295, %s1428_s12   ;;  %p1269_p0 = scmp.ge.s32.totalorder %s1428_s12, 1  ;;  %s1428_s12 = sphi %s1455_s12, %s13_s12  }
   0x2   : > { %p137_p1 = scmp.lt.s32.totalorder %s1428_s12, 3 }
   0x4   : > { %p138_p2 = pnand %p1269_p0, %p137_p1 }
   0x5   : > { %p1465_p3 = scmp.lt.s32.totalorder (!%p138_p2), %s1265_s13, 1  ;;  %vm203_vm0 = vcmask (!%p138_p2), 162816   ;;  %v1430_v0 = vmov (!%p138_p2), 0.0   ;;  %vm237_vm1 = vcmask (!%p138_p2), 31744   ;;  %s1431_s19 = smov (!%p138_p2), 4   ;;  %v842_v27 = vld [vmem:[%s2202_s1] sm:$0xff] (!%p138_p2) }
   0x6   : > { %141 = sbr.rel (%p138_p2) target bundleno = 607 (0x25f), region = 32  ;;  %220 = vst.msk [vmem:[#allocation2 + $0x80] sm:$0xff] (!%p138_p2), %vm203_vm0, %v1430_v0  ;;  %204 = vst.msk [vmem:[#allocation2] sm:$0xff] (!%p138_p2), %vm203_vm0, %v1430_v0  ;;  %s1432_s20 = smov (!%p138_p2), 8   ;;  %v843_v28 = vld [vmem:[%s2202_s1 + $0x8] sm:$0xff] (!%p138_p2)  ;;  %vm948_vm2 = vcmask (!%p138_p2), 1043456  }
   0x7   : > { %205 = vst.msk [vmem:[#allocation2 + $0x8] sm:$0xff] (!%p138_p2), %vm203_vm0, %v1430_v0  ;;  %206 = vst.msk [vmem:[#allocation2 + $0x10] sm:$0xff] (!%p138_p2), %vm203_vm0, %v1430_v0  ;;  %v1401_v29 = vpack.c.bf16 (!%p138_p2), %v843_v28, %v842_v27  ;;  %s1433_s25 = smov (!%p138_p2), 12   ;;  %v844_v30 = vld [vmem:[%s2202_s1 + $0x10] sm:$0xf] (!%p138_p2)  ;;  %s1434_s28 = smov (!%p138_p2), 16  }
   0x8   : > { %207 = vst.msk [vmem:[#allocation2 + $0x18] sm:$0xff] (!%p138_p2), %vm203_vm0, %v1430_v0  ;;  %208 = vst.msk [vmem:[#allocation2 + $0x20] sm:$0xff] (!%p138_p2), %vm203_vm0, %v1430_v0  ;;  %vm388_vm3 = vcmask (!%p138_p2), 64544   ;;  %vm517_vm4 = vcmask (!%p138_p2), 97344   ;;  %vm648_vm5 = vcmask (!%p138_p2), 129120   ;;  %vm646_vm6 = vcmask (!%p138_p2), 130144  }
   0x9   : > { %209 = vst.msk [vmem:[#allocation2 + $0x28] sm:$0xff] (!%p138_p2), %vm203_vm0, %v1430_v0  ;;  %210 = vst.msk [vmem:[#allocation2 + $0x30] sm:$0xff] (!%p138_p2), %vm203_vm0, %v1430_v0  ;;  %1402 = vmatprep.subr.bf16.mxu0 (!%p138_p2), %v1401_v29  ;;  %1405 = vmatprep.subr.bf16.mxu1 (!%p138_p2), %v1401_v29  ;;  %vm778_vm7 = vcmask (!%p138_p2), 162944   ;;  %vm776_vm8 = vcmask (!%p138_p2), 162945   ;;  %vm1177_vm9 = vcmask (!%p138_p2), 64512  }
   0xa   : > { %211 = vst.msk [vmem:[#allocation2 + $0x38] sm:$0xff] (!%p138_p2), %vm203_vm0, %v1430_v0  ;;  %212 = vst.msk [vmem:[#allocation2 + $0x40] sm:$0xff] (!%p138_p2), %vm203_vm0, %v1430_v0  ;;  %1404 = vmatpush3.bf16.msra.mxu0 (!%p138_p2), %v1401_v29  ;;  %1407 = vmatpush3.bf16.msra.mxu1 (!%p138_p2), %v1401_v29 }
   0xb   : > { %213 = vst.msk [vmem:[#allocation2 + $0x48] sm:$0xff] (!%p138_p2), %vm203_vm0, %v1430_v0  ;;  %214 = vst.msk [vmem:[#allocation2 + $0x50] sm:$0xff] (!%p138_p2), %vm203_vm0, %v1430_v0  ;;  %1351 = vmatprep.subr.msk.mxu0 (!%p138_p2), %vm948_vm2, %v844_v30  ;;  %1406 = vmatprep.subr.msk.mxu1 (!%p138_p2), %vm948_vm2, %v844_v30 }
   0xc   : > { %215 = vst.msk [vmem:[#allocation2 + $0x58] sm:$0xff] (!%p138_p2), %vm203_vm0, %v1430_v0  ;;  %216 = vst.msk [vmem:[#allocation2 + $0x60] sm:$0xff] (!%p138_p2), %vm203_vm0, %v1430_v0 }
   0xd   : > { %217 = vst.msk [vmem:[#allocation2 + $0x68] sm:$0xff] %vm203_vm0, %v1430_v0  ;;  %218 = vst.msk [vmem:[#allocation2 + $0x70] sm:$0xff] %vm203_vm0, %v1430_v0  ;;  %s2207_s13 = smov (!%p1465_p3, %s1265_s13), 1 }
   0xe   : > { %219 = vst.msk [vmem:[#allocation2 + $0x78] sm:$0xff] %vm203_vm0, %v1430_v0  ;;  %221 = vst.msk [vmem:[#allocation2 + $0x88] sm:$0xff] %vm203_vm0, %v1430_v0  ;;  %s1310_s15 = sshll.u32 %s2207_s13, 8  ;;  %1352 = vmatpush3.msk.msra.mxu0 %vm948_vm2, %v844_v30  ;;  %1408 = vmatpush3.msk.msra.mxu1 %vm948_vm2, %v844_v30 }
   0xf   : > { %222 = vst.msk [vmem:[#allocation2 + $0x90] sm:$0xff] %vm203_vm0, %v1430_v0  ;;  %223 = vst.msk [vmem:[#allocation2 + $0x98] sm:$0xff] %vm203_vm0, %v1430_v0  ;;  %s1513_s18 = scalar_lea.vmem %s2201_s0, %s1310_s15  ;;  %s2094_s6 = scalar_lea.vmem %s2204_s3, %s1310_s15 }
  0x10   : > { %224 = vst.msk [vmem:[#allocation2 + $0xa0] sm:$0xff] %vm203_vm0, %v1430_v0  ;;  %225 = vst.msk [vmem:[#allocation2 + $0xa8] sm:$0xff] %vm203_vm0, %v1430_v0  ;;  %v1516_v1 = vld [vmem:[%s1513_s18 + $0x90] sm:$0xff]  ;;  %v1522_v3 = vld [vmem:[%s1513_s18 + $0x98] sm:$0xff] }
  0x11   : > { %226 = vst.msk [vmem:[#allocation2 + $0xb0] sm:$0xff] %vm203_vm0, %v1430_v0  ;;  %227 = vst.msk [vmem:[#allocation2 + $0xb8] sm:$0xff] %vm203_vm0, %v1430_v0  ;;  %v1519_v2 = vld [vmem:[%s1513_s18 + $0x10] sm:$0xff]  ;;  %330 = vrot.lane.b32.xlu1 %v1516_v1, %s1431_s19  ;;  %v1529_v4 = vld [vmem:[%s1513_s18 + $0x18] sm:$0xff] }
  0x12   : > { %228 = vst.msk [vmem:[#allocation2 + $0xc0] sm:$0xff] %vm203_vm0, %v1430_v0  ;;  %229 = vst.msk [vmem:[#allocation2 + $0xc8] sm:$0xff] %vm203_vm0, %v1430_v0  ;;  %298 = vrot.lane.b32.xlu0 %v1519_v2, %s1431_s19  ;;  %v1532_v5 = vld [vmem:[%s1513_s18 + $0x8] sm:$0xff]  ;;  %v1541_v6 = vld [vmem:[%s1513_s18] sm:$0xff] }
  0x13   : > { %230 = vst.msk [vmem:[#allocation2 + $0xd0] sm:$0xff] %vm203_vm0, %v1430_v0  ;;  %231 = vst.msk [vmem:[#allocation2 + $0xd8] sm:$0xff] %vm203_vm0, %v1430_v0  ;;  %v1544_v7 = vld [vmem:[%s1513_s18 + $0x88] sm:$0xff]  ;;  %v1547_v8 = vld [vmem:[%s1513_s18 + $0x80] sm:$0xff] }
  0x14   : > { %232 = vst.msk [vmem:[#allocation2 + $0xe0] sm:$0xff] %vm203_vm0, %v1430_v0  ;;  %233 = vst.msk [vmem:[#allocation2 + $0xe8] sm:$0xff] %vm203_vm0, %v1430_v0  ;;  %v1554_v9 = vld [vmem:[%s1513_s18 + $0x28] sm:$0xff]  ;;  %v1557_v10 = vld [vmem:[%s1513_s18 + $0x20] sm:$0xff] }
  0x15   : > { %234 = vst.msk [vmem:[#allocation2 + $0xf0] sm:$0xff] %vm203_vm0, %v1430_v0  ;;  %235 = vst.msk [vmem:[#allocation2 + $0xf8] sm:$0xff] %vm203_vm0, %v1430_v0  ;;  %v1560_v11 = vld [vmem:[%s1513_s18 + $0xa8] sm:$0xff]  ;;  %v1569_v12 = vld [vmem:[%s1513_s18 + $0xa0] sm:$0xff]  ;;  %332 = vrot.lane.b32.xlu1 %v1522_v3, %s1431_s19 }
  0x16   : > { %240 = vst.msk [vmem:[#allocation2 + $0x20] sm:$0xff] %vm237_vm1, %v1519_v2  ;;  %256 = vst.msk [vmem:[#allocation2 + $0xa0] sm:$0xff] %vm237_vm1, %v1516_v1  ;;  %v1572_v13 = vld [vmem:[%s1513_s18 + $0x38] sm:$0xff]  ;;  %v1575_v14 = vld [vmem:[%s1513_s18 + $0x30] sm:$0xff]  ;;  %300 = vrot.lane.b32.xlu0 %v1529_v4, %s1431_s19 }
  0x17   : > { %257 = vst.msk [vmem:[#allocation2 + $0xa8] sm:$0xff] %vm237_vm1, %v1522_v3  ;;  %239 = vst.msk [vmem:[#allocation2 + $0x18] sm:$0xff] %vm237_vm1, %v1532_v5  ;;  %v1588_v15 = vld [vmem:[%s1513_s18 + $0xb8] sm:$0xff]  ;;  %v1591_v16 = vld [vmem:[%s1513_s18 + $0xb0] sm:$0xff] }
  0x18   : > { %241 = vst.msk [vmem:[#allocation2 + $0x28] sm:$0xff] %vm237_vm1, %v1529_v4  ;;  %238 = vst.msk [vmem:[#allocation2 + $0x10] sm:$0xff] %vm237_vm1, %v1541_v6  ;;  %v1600_v17 = vld [vmem:[%s1513_s18 + $0x48] sm:$0xff]  ;;  %v1603_v18 = vld [vmem:[%s1513_s18 + $0x40] sm:$0xff] }
  0x19   : > { %254 = vst.msk [vmem:[#allocation2 + $0x90] sm:$0xff] %vm237_vm1, %v1547_v8  ;;  %255 = vst.msk [vmem:[#allocation2 + $0x98] sm:$0xff] %vm237_vm1, %v1544_v7  ;;  %v1606_v19 = vld [vmem:[%s1513_s18 + $0xc8] sm:$0xff]  ;;  %v1613_v20 = vld [vmem:[%s1513_s18 + $0xc0] sm:$0xff]  ;;  %423 = vrot.lane.b32.xlu1 %v1532_v5, %s1432_s20 }
  0x1a   : > { %242 = vst.msk [vmem:[#allocation2 + $0x30] sm:$0xff] %vm237_vm1, %v1557_v10  ;;  %243 = vst.msk [vmem:[#allocation2 + $0x38] sm:$0xff] %vm237_vm1, %v1554_v9  ;;  %v1616_v21 = vld [vmem:[%s1513_s18 + $0x70] sm:$0xff]  ;;  %v1625_v22 = vld [vmem:[%s1513_s18 + $0x78] sm:$0xff]  ;;  %421 = vrot.lane.b32.xlu0 %v1541_v6, %s1432_s20 }
  0x1b   : > { %259 = vst.msk [vmem:[#allocation2 + $0xb8] sm:$0xff] %vm237_vm1, %v1560_v11  ;;  %244 = vst.msk [vmem:[#allocation2 + $0x40] sm:$0xff] %vm237_vm1, %v1575_v14  ;;  %v1634_v23 = vld [vmem:[%s1513_s18 + $0x58] sm:$0xff]  ;;  %v1637_v24 = vld [vmem:[%s1513_s18 + $0x50] sm:$0xff] }
  0x1c   : > { %245 = vst.msk [vmem:[#allocation2 + $0x48] sm:$0xff] %vm237_vm1, %v1572_v13  ;;  %258 = vst.msk [vmem:[#allocation2 + $0xb0] sm:$0xff] %vm237_vm1, %v1569_v12  ;;  %v1640_v25 = vld [vmem:[%s1513_s18 + $0xd8] sm:$0xff]  ;;  %v1653_v26 = vld [vmem:[%s1513_s18 + $0xd0] sm:$0xff] }
  0x1d   : > { %260 = vst.msk [vmem:[#allocation2 + $0xc0] sm:$0xff] %vm237_vm1, %v1591_v16  ;;  %261 = vst.msk [vmem:[#allocation2 + $0xc8] sm:$0xff] %vm237_vm1, %v1588_v15  ;;  %455 = vrot.lane.b32.xlu1 %v1544_v7, %s1432_s20  ;;  %v1687_v31 = vld [vmem:[%s1513_s18 + $0x68] sm:$0xff]  ;;  %v1696_v32 = vld [vmem:[%s1513_s18 + $0x60] sm:$0xff] }
  0x1e   : > { %246 = vst.msk [vmem:[#allocation2 + $0x50] sm:$0xff] %vm237_vm1, %v1603_v18  ;;  %247 = vst.msk [vmem:[#allocation2 + $0x58] sm:$0xff] %vm237_vm1, %v1600_v17  ;;  %453 = vrot.lane.b32.xlu0 %v1547_v8, %s1432_s20  ;;  %v1701_v33 = vld [vmem:[%s1513_s18 + $0xe8] sm:$0xff]  ;;  %v1710_v34 = vld [vmem:[%s1513_s18 + $0xe0] sm:$0xff] }
  0x1f   : > { %263 = vst.msk [vmem:[#allocation2 + $0xd8] sm:$0xff] %vm237_vm1, %v1606_v19  ;;  %252 = vst.msk [vmem:[#allocation2 + $0x80] sm:$0xff] %vm237_vm1, %v1616_v21 }
  0x20   : > { %262 = vst.msk [vmem:[#allocation2 + $0xd0] sm:$0xff] %vm237_vm1, %v1613_v20  ;;  %253 = vst.msk [vmem:[#allocation2 + $0x88] sm:$0xff] %vm237_vm1, %v1625_v22 }
  0x21   : > { %249 = vst.msk [vmem:[#allocation2 + $0x68] sm:$0xff] %vm237_vm1, %v1634_v23  ;;  %248 = vst.msk [vmem:[#allocation2 + $0x60] sm:$0xff] %vm237_vm1, %v1637_v24  ;;  %552 = vrot.lane.b32.xlu1 %v1532_v5, %s1433_s25 }
  0x22   : > { %265 = vst.msk [vmem:[#allocation2 + $0xe8] sm:$0xff] %vm237_vm1, %v1640_v25  ;;  %264 = vst.msk [vmem:[#allocation2 + $0xe0] sm:$0xff] %vm237_vm1, %v1653_v26  ;;  %550 = vrot.lane.b32.xlu0 %v1541_v6, %s1433_s25 }
  0x23   : > { %251 = vst.msk [vmem:[#allocation2 + $0x78] sm:$0xff] %vm237_vm1, %v1687_v31  ;;  %250 = vst.msk [vmem:[#allocation2 + $0x70] sm:$0xff] %vm237_vm1, %v1696_v32 }
  0x24   : > { %267 = vst.msk [vmem:[#allocation2 + $0xf8] sm:$0xff] %vm237_vm1, %v1701_v33  ;;  %266 = vst.msk [vmem:[#allocation2 + $0xf0] sm:$0xff] %vm237_vm1, %v1710_v34 }
  0x25   : > { %584 = vrot.lane.b32.xlu1 %v1544_v7, %s1433_s25 }
  0x26   : > { %582 = vrot.lane.b32.xlu0 %v1547_v8, %s1433_s25 }
  0x29   : > { %682 = vrot.lane.b32.xlu1 %v1532_v5, %s1434_s28 }
  0x2a   : > { %680 = vrot.lane.b32.xlu0 %v1541_v6, %s1434_s28 }
  0x2d   : > { %714 = vrot.lane.b32.xlu1 %v1544_v7, %s1434_s28 }
  0x2e   : > { %712 = vrot.lane.b32.xlu0 %v1547_v8, %s1434_s28 }
  0x31   : > { %304 = vrot.lane.b32.xlu1 %v1554_v9, %s1431_s19 }
  0x32   : > { %302 = vrot.lane.b32.xlu0 %v1557_v10, %s1431_s19 }
  0x35   : > { %336 = vrot.lane.b32.xlu1 %v1560_v11, %s1431_s19 }
  0x36   : > { %334 = vrot.lane.b32.xlu0 %v1569_v12, %s1431_s19 }
  0x39   : > { %427 = vrot.lane.b32.xlu1 %v1529_v4, %s1432_s20 }
  0x3a   : > { %425 = vrot.lane.b32.xlu0 %v1519_v2, %s1432_s20 }
  0x3d   : > { %459 = vrot.lane.b32.xlu1 %v1522_v3, %s1432_s20 }
  0x3e   : > { %457 = vrot.lane.b32.xlu0 %v1516_v1, %s1432_s20 }
  0x41   : > { %556 = vrot.lane.b32.xlu1 %v1529_v4, %s1433_s25 }
  0x42   : > { %554 = vrot.lane.b32.xlu0 %v1519_v2, %s1433_s25 }
  0x45   : > { %588 = vrot.lane.b32.xlu1 %v1522_v3, %s1433_s25 }
  0x46   : > { %586 = vrot.lane.b32.xlu0 %v1516_v1, %s1433_s25 }
  0x49   : > { %686 = vrot.lane.b32.xlu1 %v1529_v4, %s1434_s28 }
  0x4a   : > { %684 = vrot.lane.b32.xlu0 %v1519_v2, %s1434_s28 }
  0x4d   : > { %718 = vrot.lane.b32.xlu1 %v1522_v3, %s1434_s28 }
  0x4e   : > { %716 = vrot.lane.b32.xlu0 %v1516_v1, %s1434_s28 }
  0x51   : > { %308 = vrot.lane.b32.xlu1 %v1572_v13, %s1431_s19 }
  0x52   : > { %306 = vrot.lane.b32.xlu0 %v1575_v14, %s1431_s19 }
  0x55   : > { %340 = vrot.lane.b32.xlu1 %v1588_v15, %s1431_s19 }
  0x56   : > { %338 = vrot.lane.b32.xlu0 %v1591_v16, %s1431_s19 }
  0x59   : > { %431 = vrot.lane.b32.xlu1 %v1554_v9, %s1432_s20 }
  0x5a   : > { %429 = vrot.lane.b32.xlu0 %v1557_v10, %s1432_s20 }
  0x5d   : > { %463 = vrot.lane.b32.xlu1 %v1560_v11, %s1432_s20 }
  0x5e   : > { %461 = vrot.lane.b32.xlu0 %v1569_v12, %s1432_s20 }
  0x61   : > { %560 = vrot.lane.b32.xlu1 %v1554_v9, %s1433_s25 }
  0x62   : > { %558 = vrot.lane.b32.xlu0 %v1557_v10, %s1433_s25 }
  0x65   : > { %592 = vrot.lane.b32.xlu1 %v1560_v11, %s1433_s25 }
  0x66   : > { %590 = vrot.lane.b32.xlu0 %v1569_v12, %s1433_s25 }
  0x69   : > { %690 = vrot.lane.b32.xlu1 %v1554_v9, %s1434_s28 }
  0x6a   : > { %688 = vrot.lane.b32.xlu0 %v1557_v10, %s1434_s28 }
  0x6d   : > { %722 = vrot.lane.b32.xlu1 %v1560_v11, %s1434_s28 }
  0x6e   : > { %720 = vrot.lane.b32.xlu0 %v1569_v12, %s1434_s28 }
  0x71   : > { %312 = vrot.lane.b32.xlu1 %v1600_v17, %s1431_s19 }
  0x72   : > { %310 = vrot.lane.b32.xlu0 %v1603_v18, %s1431_s19 }
  0x75   : > { %344 = vrot.lane.b32.xlu1 %v1606_v19, %s1431_s19 }
  0x76   : > { %342 = vrot.lane.b32.xlu0 %v1613_v20, %s1431_s19 }
  0x79   : > { %435 = vrot.lane.b32.xlu1 %v1572_v13, %s1432_s20 }
  0x7a   : > { %433 = vrot.lane.b32.xlu0 %v1575_v14, %s1432_s20 }
  0x7d   : > { %467 = vrot.lane.b32.xlu1 %v1588_v15, %s1432_s20 }
  0x7e   : > { %465 = vrot.lane.b32.xlu0 %v1591_v16, %s1432_s20 }
  0x81   : > { %564 = vrot.lane.b32.xlu1 %v1572_v13, %s1433_s25 }
  0x82   : > { %562 = vrot.lane.b32.xlu0 %v1575_v14, %s1433_s25 }
  0x83   : > { %v331_v35 = vpop.permute.xlu1 %330 }
  0x84   : > { %v299_v36 = vpop.permute.xlu0 %298  ;;  %405 = vst.msk [vmem:[#allocation2 + $0x80] sm:$0xff] %vm388_vm3, %v331_v35 }
  0x85   : > { %389 = vst.msk [vmem:[#allocation2] sm:$0xff] %vm388_vm3, %v299_v36  ;;  %596 = vrot.lane.b32.xlu1 %v1588_v15, %s1433_s25 }
  0x86   : > { %594 = vrot.lane.b32.xlu0 %v1591_v16, %s1433_s25 }
  0x87   : > { %v333_v37 = vpop.permute.xlu1 %332 }
  0x88   : > { %v301_v38 = vpop.permute.xlu0 %300  ;;  %406 = vst.msk [vmem:[#allocation2 + $0x88] sm:$0xff] %vm388_vm3, %v333_v37 }
  0x89   : > { %390 = vst.msk [vmem:[#allocation2 + $0x8] sm:$0xff] %vm388_vm3, %v301_v38  ;;  %694 = vrot.lane.b32.xlu1 %v1572_v13, %s1434_s28 }
  0x8a   : > { %692 = vrot.lane.b32.xlu0 %v1575_v14, %s1434_s28 }
  0x8b   : > { %v424_v39 = vpop.permute.xlu1 %423 }
  0x8c   : > { %v422_v40 = vpop.permute.xlu0 %421  ;;  %519 = vst.msk [vmem:[#allocation2 + $0x8] sm:$0xff] %vm517_vm4, %v424_v39 }
  0x8d   : > { %518 = vst.msk [vmem:[#allocation2] sm:$0xff] %vm517_vm4, %v422_v40  ;;  %726 = vrot.lane.b32.xlu1 %v1588_v15, %s1434_s28 }
  0x8e   : > { %724 = vrot.lane.b32.xlu0 %v1591_v16, %s1434_s28 }
  0x8f   : > { %v456_v41 = vpop.permute.xlu1 %455 }
  0x90   : > { %v454_v42 = vpop.permute.xlu0 %453  ;;  %535 = vst.msk [vmem:[#allocation2 + $0x88] sm:$0xff] %vm517_vm4, %v456_v41 }
  0x91   : > { %534 = vst.msk [vmem:[#allocation2 + $0x80] sm:$0xff] %vm517_vm4, %v454_v42  ;;  %316 = vrot.lane.b32.xlu1 %v1634_v23, %s1431_s19 }
  0x92   : > { %314 = vrot.lane.b32.xlu0 %v1637_v24, %s1431_s19 }
  0x93   : > { %v553_v43 = vpop.permute.xlu1 %552 }
  0x94   : > { %v551_v44 = vpop.permute.xlu0 %550  ;;  %649 = vst.msk [vmem:[#allocation2 + $0x9] sm:$0x7f] %vm648_vm5, %v553_v43 }
  0x95   : > { %647 = vst.msk [vmem:[#allocation2 + $0x1] sm:$0xff] %vm646_vm6, %v551_v44  ;;  %348 = vrot.lane.b32.xlu1 %v1640_v25, %s1431_s19 }
  0x96   : > { %346 = vrot.lane.b32.xlu0 %v1653_v26, %s1431_s19 }
  0x97   : > { %v585_v45 = vpop.permute.xlu1 %584 }
  0x98   : > { %v583_v46 = vpop.permute.xlu0 %582  ;;  %665 = vst.msk [vmem:[#allocation2 + $0x89] sm:$0x7f] %vm648_vm5, %v585_v45 }
  0x99   : > { %664 = vst.msk [vmem:[#allocation2 + $0x81] sm:$0xff] %vm646_vm6, %v583_v46  ;;  %439 = vrot.lane.b32.xlu1 %v1600_v17, %s1432_s20 }
  0x9a   : > { %437 = vrot.lane.b32.xlu0 %v1603_v18, %s1432_s20 }
  0x9b   : > { %v683_v47 = vpop.permute.xlu1 %682 }
  0x9c   : > { %v681_v48 = vpop.permute.xlu0 %680  ;;  %779 = vst.msk [vmem:[#allocation2 + $0x7] sm:$0xff] %vm778_vm7, %v683_v47 }
  0x9d   : > { %777 = vst.msk [vmem:[#allocation2 - $0x1] sm:$0xfe] %vm776_vm8, %v681_v48  ;;  %471 = vrot.lane.b32.xlu1 %v1606_v19, %s1432_s20 }
  0x9e   : > { %469 = vrot.lane.b32.xlu0 %v1613_v20, %s1432_s20 }
  0x9f   : > { %v715_v49 = vpop.permute.xlu1 %714 }
  0xa0   : > { %v713_v50 = vpop.permute.xlu0 %712  ;;  %795 = vst.msk [vmem:[#allocation2 + $0x87] sm:$0xff] %vm778_vm7, %v715_v49 }
  0xa1   : > { %794 = vst.msk [vmem:[#allocation2 + $0x7f] sm:$0xfe] %vm776_vm8, %v713_v50  ;;  %568 = vrot.lane.b32.xlu1 %v1600_v17, %s1433_s25 }
  0xa2   : > { %566 = vrot.lane.b32.xlu0 %v1603_v18, %s1433_s25 }
  0xa3   : > { %v305_v51 = vpop.permute.xlu1 %304  ;;  %v811_v54 = vld [vmem:[#allocation2 + $0x8] sm:$0xff] }
  0xa4   : > { %v303_v52 = vpop.permute.xlu0 %302  ;;  %v810_v53 = vld [vmem:[#allocation2] sm:$0xff]  ;;  %392 = vst.msk [vmem:[#allocation2 + $0x18] sm:$0xff] %vm388_vm3, %v305_v51 }
  0xa5   : > { %391 = vst.msk [vmem:[#allocation2 + $0x10] sm:$0xff] %vm388_vm3, %v303_v52  ;;  %1353 = vmatprep.mubr.msk.f32.mxu0 %vm203_vm0, %v810_v53  ;;  %600 = vrot.lane.b32.xlu1 %v1606_v19, %s1433_s25 }
  0xa6   : > { %598 = vrot.lane.b32.xlu0 %v1613_v20, %s1433_s25  ;;  %1354 = vmatmul.mubr.msk.f32.vlgmr.msra.gmra.mrb[0].mxu0 %vm203_vm0, %v811_v54 }
  0xa7   : > { %v337_v55 = vpop.permute.xlu1 %336  ;;  %v827_v58 = vld [vmem:[#allocation2 + $0x88] sm:$0xff] }
  0xa8   : > { %v335_v56 = vpop.permute.xlu0 %334  ;;  %v826_v57 = vld [vmem:[#allocation2 + $0x80] sm:$0xff]  ;;  %408 = vst.msk [vmem:[#allocation2 + $0x98] sm:$0xff] %vm388_vm3, %v337_v55 }
  0xa9   : > { %407 = vst.msk [vmem:[#allocation2 + $0x90] sm:$0xff] %vm388_vm3, %v335_v56  ;;  %1377 = vmatprep.mubr.msk.f32.mxu1 %vm203_vm0, %v826_v57  ;;  %698 = vrot.lane.b32.xlu1 %v1600_v17, %s1434_s28 }
  0xaa   : > { %696 = vrot.lane.b32.xlu0 %v1603_v18, %s1434_s28  ;;  %1378 = vmatmul.mubr.msk.f32.vlgmr.msra.gmra.mrb[0].mxu1 %vm203_vm0, %v827_v58 }
  0xab   : > { %v428_v59 = vpop.permute.xlu1 %427 }
  0xac   : > { %v426_v60 = vpop.permute.xlu0 %425  ;;  %521 = vst.msk [vmem:[#allocation2 + $0x18] sm:$0xff] %vm517_vm4, %v428_v59 }
  0xad   : > { %520 = vst.msk [vmem:[#allocation2 + $0x10] sm:$0xff] %vm517_vm4, %v426_v60  ;;  %730 = vrot.lane.b32.xlu1 %v1606_v19, %s1434_s28 }
  0xae   : > { %728 = vrot.lane.b32.xlu0 %v1613_v20, %s1434_s28 }
  0xaf   : > { %v460_v61 = vpop.permute.xlu1 %459 }
  0xb0   : > { %v458_v62 = vpop.permute.xlu0 %457  ;;  %537 = vst.msk [vmem:[#allocation2 + $0x98] sm:$0xff] %vm517_vm4, %v460_v61 }
  0xb1   : > { %536 = vst.msk [vmem:[#allocation2 + $0x90] sm:$0xff] %vm517_vm4, %v458_v62  ;;  %320 = vrot.lane.b32.xlu1 %v1687_v31, %s1431_s19 }
  0xb2   : > { %318 = vrot.lane.b32.xlu0 %v1696_v32, %s1431_s19 }
  0xb3   : > { %v557_v63 = vpop.permute.xlu1 %556 }
  0xb4   : > { %v555_v0 = vpop.permute.xlu0 %554  ;;  %651 = vst.msk [vmem:[#allocation2 + $0x19] sm:$0x7f] %vm648_vm5, %v557_v63 }
  0xb5   : > { %650 = vst.msk [vmem:[#allocation2 + $0x11] sm:$0xff] %vm646_vm6, %v555_v0  ;;  %352 = vrot.lane.b32.xlu1 %v1701_v33, %s1431_s19 }
  0xb6   : > { %350 = vrot.lane.b32.xlu0 %v1710_v34, %s1431_s19 }
  0xb7   : > { %v589_v1 = vpop.permute.xlu1 %588 }
  0xb8   : > { %v587_v2 = vpop.permute.xlu0 %586  ;;  %667 = vst.msk [vmem:[#allocation2 + $0x99] sm:$0x7f] %vm648_vm5, %v589_v1 }
  0xb9   : > { %666 = vst.msk [vmem:[#allocation2 + $0x91] sm:$0xff] %vm646_vm6, %v587_v2  ;;  %443 = vrot.lane.b32.xlu1 %v1634_v23, %s1432_s20 }
  0xba   : > { %441 = vrot.lane.b32.xlu0 %v1637_v24, %s1432_s20 }
  0xbb   : > { %v687_v3 = vpop.permute.xlu1 %686 }
  0xbc   : > { %v685_v4 = vpop.permute.xlu0 %684  ;;  %781 = vst.msk [vmem:[#allocation2 + $0x17] sm:$0xff] %vm778_vm7, %v687_v3 }
  0xbd   : > { %780 = vst.msk [vmem:[#allocation2 + $0xf] sm:$0xfe] %vm776_vm8, %v685_v4  ;;  %475 = vrot.lane.b32.xlu1 %v1640_v25, %s1432_s20 }
  0xbe   : > { %473 = vrot.lane.b32.xlu0 %v1653_v26, %s1432_s20 }
  0xbf   : > { %v719_v5 = vpop.permute.xlu1 %718 }
  0xc0   : > { %v717_v6 = vpop.permute.xlu0 %716  ;;  %797 = vst.msk [vmem:[#allocation2 + $0x97] sm:$0xff] %vm778_vm7, %v719_v5 }
  0xc1   : > { %796 = vst.msk [vmem:[#allocation2 + $0x8f] sm:$0xfe] %vm776_vm8, %v717_v6  ;;  %572 = vrot.lane.b32.xlu1 %v1634_v23, %s1433_s25 }
  0xc2   : > { %570 = vrot.lane.b32.xlu0 %v1637_v24, %s1433_s25 }
  0xc3   : > { %v309_v9 = vpop.permute.xlu1 %308  ;;  %v813_v12 = vld [vmem:[#allocation2 + $0x18] sm:$0xff] }
  0xc4   : > { %v307_v10 = vpop.permute.xlu0 %306  ;;  %v812_v11 = vld [vmem:[#allocation2 + $0x10] sm:$0xff]  ;;  %394 = vst.msk [vmem:[#allocation2 + $0x28] sm:$0xff] %vm388_vm3, %v309_v9 }
  0xc5   : > { %393 = vst.msk [vmem:[#allocation2 + $0x20] sm:$0xff] %vm388_vm3, %v307_v10  ;;  %1356 = vmatprep.mubr.msk.f32.mxu0 %vm203_vm0, %v812_v11  ;;  %604 = vrot.lane.b32.xlu1 %v1640_v25, %s1433_s25 }
  0xc6   : > { %602 = vrot.lane.b32.xlu0 %v1653_v26, %s1433_s25  ;;  %1357 = vmatmul.mubr.msk.f32.gmra.mrb[2].mxu0 %vm203_vm0, %v813_v12 }
  0xc7   : > { %v341_v13 = vpop.permute.xlu1 %340  ;;  %v829_v16 = vld [vmem:[#allocation2 + $0x98] sm:$0xff] }
  0xc8   : > { %v339_v14 = vpop.permute.xlu0 %338  ;;  %v828_v15 = vld [vmem:[#allocation2 + $0x90] sm:$0xff]  ;;  %410 = vst.msk [vmem:[#allocation2 + $0xa8] sm:$0xff] %vm388_vm3, %v341_v13 }
  0xc9   : > { %409 = vst.msk [vmem:[#allocation2 + $0xa0] sm:$0xff] %vm388_vm3, %v339_v14  ;;  %1380 = vmatprep.mubr.msk.f32.mxu1 %vm203_vm0, %v828_v15  ;;  %702 = vrot.lane.b32.xlu1 %v1634_v23, %s1434_s28  ;;  %v1919_v23 = vld [vmem:[%s1513_s18 + $0xf8] sm:$0xff] }
  0xca   : > { %700 = vrot.lane.b32.xlu0 %v1637_v24, %s1434_s28  ;;  %1381 = vmatmul.mubr.msk.f32.gmra.mrb[2].mxu1 %vm203_vm0, %v829_v16  ;;  %v1922_v24 = vld [vmem:[%s1513_s18 + $0xf0] sm:$0xff] }
  0xcb   : > { %v432_v17 = vpop.permute.xlu1 %431 }
  0xcc   : > { %v430_v18 = vpop.permute.xlu0 %429  ;;  %523 = vst.msk [vmem:[#allocation2 + $0x28] sm:$0xff] %vm517_vm4, %v432_v17 }
  0xcd   : > { %522 = vst.msk [vmem:[#allocation2 + $0x20] sm:$0xff] %vm517_vm4, %v430_v18  ;;  %734 = vrot.lane.b32.xlu1 %v1640_v25, %s1434_s28 }
  0xce   : > { %732 = vrot.lane.b32.xlu0 %v1653_v26, %s1434_s28 }
  0xcf   : > { %v464_v19 = vpop.permute.xlu1 %463 }
  0xd0   : > { %v462_v20 = vpop.permute.xlu0 %461  ;;  %539 = vst.msk [vmem:[#allocation2 + $0xa8] sm:$0xff] %vm517_vm4, %v464_v19 }
  0xd1   : > { %538 = vst.msk [vmem:[#allocation2 + $0xa0] sm:$0xff] %vm517_vm4, %v462_v20  ;;  %324 = vrot.lane.b32.xlu1 %v1625_v22, %s1431_s19 }
  0xd2   : > { %322 = vrot.lane.b32.xlu0 %v1616_v21, %s1431_s19 }
  0xd3   : > { %v561_v25 = vpop.permute.xlu1 %560 }
  0xd4   : > { %v559_v27 = vpop.permute.xlu0 %558  ;;  %653 = vst.msk [vmem:[#allocation2 + $0x29] sm:$0x7f] %vm648_vm5, %v561_v25 }
  0xd5   : > { %652 = vst.msk [vmem:[#allocation2 + $0x21] sm:$0xff] %vm646_vm6, %v559_v27  ;;  %356 = vrot.lane.b32.xlu1 %v1919_v23, %s1431_s19 }
  0xd6   : > { %354 = vrot.lane.b32.xlu0 %v1922_v24, %s1431_s19 }
  0xd7   : > { %v593_v26 = vpop.permute.xlu1 %592 }
  0xd8   : > { %v591_v28 = vpop.permute.xlu0 %590  ;;  %669 = vst.msk [vmem:[#allocation2 + $0xa9] sm:$0x7f] %vm648_vm5, %v593_v26 }
  0xd9   : > { %668 = vst.msk [vmem:[#allocation2 + $0xa1] sm:$0xff] %vm646_vm6, %v591_v28  ;;  %447 = vrot.lane.b32.xlu1 %v1687_v31, %s1432_s20 }
  0xda   : > { %445 = vrot.lane.b32.xlu0 %v1696_v32, %s1432_s20 }
  0xdb   : > { %v691_v29 = vpop.permute.xlu1 %690 }
  0xdc   : > { %v689_v30 = vpop.permute.xlu0 %688  ;;  %783 = vst.msk [vmem:[#allocation2 + $0x27] sm:$0xff] %vm778_vm7, %v691_v29 }
  0xdd   : > { %782 = vst.msk [vmem:[#allocation2 + $0x1f] sm:$0xfe] %vm776_vm8, %v689_v30  ;;  %479 = vrot.lane.b32.xlu1 %v1701_v33, %s1432_s20 }
  0xde   : > { %477 = vrot.lane.b32.xlu0 %v1710_v34, %s1432_s20 }
  0xdf   : > { %v723_v35 = vpop.permute.xlu1 %722 }
  0xe0   : > { %v721_v36 = vpop.permute.xlu0 %720  ;;  %799 = vst.msk [vmem:[#allocation2 + $0xa7] sm:$0xff] %vm778_vm7, %v723_v35 }
  0xe1   : > { %798 = vst.msk [vmem:[#allocation2 + $0x9f] sm:$0xfe] %vm776_vm8, %v721_v36  ;;  %576 = vrot.lane.b32.xlu1 %v1687_v31, %s1433_s25 }
  0xe2   : > { %574 = vrot.lane.b32.xlu0 %v1696_v32, %s1433_s25 }
  0xe3   : > { %v313_v37 = vpop.permute.xlu1 %312  ;;  %v815_v40 = vld [vmem:[#allocation2 + $0x28] sm:$0xff] }
  0xe4   : > { %v311_v38 = vpop.permute.xlu0 %310  ;;  %v814_v39 = vld [vmem:[#allocation2 + $0x20] sm:$0xff]  ;;  %396 = vst.msk [vmem:[#allocation2 + $0x38] sm:$0xff] %vm388_vm3, %v313_v37 }
  0xe5   : > { %395 = vst.msk [vmem:[#allocation2 + $0x30] sm:$0xff] %vm388_vm3, %v311_v38  ;;  %1359 = vmatprep.mubr.msk.f32.mxu0 %vm203_vm0, %v814_v39  ;;  %608 = vrot.lane.b32.xlu1 %v1701_v33, %s1433_s25 }
  0xe6   : > { %606 = vrot.lane.b32.xlu0 %v1710_v34, %s1433_s25  ;;  %1360 = vmatmul.mubr.msk.f32.gmra.mrb[4].mxu0 %vm203_vm0, %v815_v40 }
  0xe7   : > { %v345_v41 = vpop.permute.xlu1 %344  ;;  %v831_v44 = vld [vmem:[#allocation2 + $0xa8] sm:$0xff] }
  0xe8   : > { %v343_v42 = vpop.permute.xlu0 %342  ;;  %v830_v43 = vld [vmem:[#allocation2 + $0xa0] sm:$0xff]  ;;  %412 = vst.msk [vmem:[#allocation2 + $0xb8] sm:$0xff] %vm388_vm3, %v345_v41 }
  0xe9   : > { %411 = vst.msk [vmem:[#allocation2 + $0xb0] sm:$0xff] %vm388_vm3, %v343_v42  ;;  %1383 = vmatprep.mubr.msk.f32.mxu1 %vm203_vm0, %v830_v43  ;;  %706 = vrot.lane.b32.xlu1 %v1687_v31, %s1434_s28 }
  0xea   : > { %704 = vrot.lane.b32.xlu0 %v1696_v32, %s1434_s28  ;;  %1384 = vmatmul.mubr.msk.f32.gmra.mrb[4].mxu1 %vm203_vm0, %v831_v44 }
  0xeb   : > { %v436_v45 = vpop.permute.xlu1 %435 }
  0xec   : > { %v434_v46 = vpop.permute.xlu0 %433  ;;  %525 = vst.msk [vmem:[#allocation2 + $0x38] sm:$0xff] %vm517_vm4, %v436_v45 }
  0xed   : > { %524 = vst.msk [vmem:[#allocation2 + $0x30] sm:$0xff] %vm517_vm4, %v434_v46  ;;  %738 = vrot.lane.b32.xlu1 %v1701_v33, %s1434_s28 }
  0xee   : > { %736 = vrot.lane.b32.xlu0 %v1710_v34, %s1434_s28 }
  0xef   : > { %v468_v47 = vpop.permute.xlu1 %467 }
  0xf0   : > { %v466_v48 = vpop.permute.xlu0 %465  ;;  %541 = vst.msk [vmem:[#allocation2 + $0xb8] sm:$0xff] %vm517_vm4, %v468_v47 }
  0xf1   : > { %540 = vst.msk [vmem:[#allocation2 + $0xb0] sm:$0xff] %vm517_vm4, %v466_v48  ;;  %328 = vrot.lane.b32.xlu1 %v1544_v7, %s1431_s19 }
  0xf2   : > { %326 = vrot.lane.b32.xlu0 %v1547_v8, %s1431_s19 }
  0xf3   : > { %v565_v31 = vpop.permute.xlu1 %564 }
  0xf4   : > { %v563_v32 = vpop.permute.xlu0 %562  ;;  %655 = vst.msk [vmem:[#allocation2 + $0x39] sm:$0x7f] %vm648_vm5, %v565_v31 }
  0xf5   : > { %654 = vst.msk [vmem:[#allocation2 + $0x31] sm:$0xff] %vm646_vm6, %v563_v32  ;;  %451 = vrot.lane.b32.xlu1 %v1625_v22, %s1432_s20 }
  0xf6   : > { %449 = vrot.lane.b32.xlu0 %v1616_v21, %s1432_s20 }
  0xf7   : > { %v597_v33 = vpop.permute.xlu1 %596 }
  0xf8   : > { %v595_v34 = vpop.permute.xlu0 %594  ;;  %671 = vst.msk [vmem:[#allocation2 + $0xb9] sm:$0x7f] %vm648_vm5, %v597_v33 }
  0xf9   : > { %670 = vst.msk [vmem:[#allocation2 + $0xb1] sm:$0xff] %vm646_vm6, %v595_v34  ;;  %483 = vrot.lane.b32.xlu1 %v1919_v23, %s1432_s20 }
  0xfa   : > { %481 = vrot.lane.b32.xlu0 %v1922_v24, %s1432_s20 }
  0xfb   : > { %v695_v7 = vpop.permute.xlu1 %694 }
  0xfc   : > { %v693_v8 = vpop.permute.xlu0 %692  ;;  %785 = vst.msk [vmem:[#allocation2 + $0x37] sm:$0xff] %vm778_vm7, %v695_v7 }
  0xfd   : > { %784 = vst.msk [vmem:[#allocation2 + $0x2f] sm:$0xfe] %vm776_vm8, %v693_v8  ;;  %580 = vrot.lane.b32.xlu1 %v1625_v22, %s1433_s25 }
  0xfe   : > { %578 = vrot.lane.b32.xlu0 %v1616_v21, %s1433_s25 }
  0xff   : > { %v727_v49 = vpop.permute.xlu1 %726 }
 0x100   : > { %v725_v50 = vpop.permute.xlu0 %724  ;;  %801 = vst.msk [vmem:[#allocation2 + $0xb7] sm:$0xff] %vm778_vm7, %v727_v49 }
 0x101   : > { %800 = vst.msk [vmem:[#allocation2 + $0xaf] sm:$0xfe] %vm776_vm8, %v725_v50  ;;  %612 = vrot.lane.b32.xlu1 %v1919_v23, %s1433_s25 }
 0x102   : > { %610 = vrot.lane.b32.xlu0 %v1922_v24, %s1433_s25 }
 0x103   : > { %v317_v51 = vpop.permute.xlu1 %316  ;;  %v817_v54 = vld [vmem:[#allocation2 + $0x38] sm:$0xff] }
 0x104   : > { %v315_v52 = vpop.permute.xlu0 %314  ;;  %v816_v53 = vld [vmem:[#allocation2 + $0x30] sm:$0xff]  ;;  %398 = vst.msk [vmem:[#allocation2 + $0x48] sm:$0xff] %vm388_vm3, %v317_v51 }
 0x105   : > { %397 = vst.msk [vmem:[#allocation2 + $0x40] sm:$0xff] %vm388_vm3, %v315_v52  ;;  %1362 = vmatprep.mubr.msk.f32.mxu0 %vm203_vm0, %v816_v53  ;;  %710 = vrot.lane.b32.xlu1 %v1625_v22, %s1434_s28 }
 0x106   : > { %708 = vrot.lane.b32.xlu0 %v1616_v21, %s1434_s28  ;;  %1363 = vmatmul.mubr.msk.f32.gmra.mrb[6].mxu0 %vm203_vm0, %v817_v54 }
 0x107   : > { %v349_v55 = vpop.permute.xlu1 %348  ;;  %v833_v58 = vld [vmem:[#allocation2 + $0xb8] sm:$0xff] }
 0x108   : > { %v347_v56 = vpop.permute.xlu0 %346  ;;  %v832_v57 = vld [vmem:[#allocation2 + $0xb0] sm:$0xff]  ;;  %414 = vst.msk [vmem:[#allocation2 + $0xc8] sm:$0xff] %vm388_vm3, %v349_v55 }
 0x109   : > { %413 = vst.msk [vmem:[#allocation2 + $0xc0] sm:$0xff] %vm388_vm3, %v347_v56  ;;  %1386 = vmatprep.mubr.msk.f32.mxu1 %vm203_vm0, %v832_v57  ;;  %742 = vrot.lane.b32.xlu1 %v1919_v23, %s1434_s28 }
 0x10a   : > { %740 = vrot.lane.b32.xlu0 %v1922_v24, %s1434_s28  ;;  %1387 = vmatmul.mubr.msk.f32.gmra.mrb[6].mxu1 %vm203_vm0, %v833_v58 }
 0x10b   : > { %v440_v21 = vpop.permute.xlu1 %439 }
 0x10c   : > { %v438_v22 = vpop.permute.xlu0 %437  ;;  %527 = vst.msk [vmem:[#allocation2 + $0x48] sm:$0xff] %vm517_vm4, %v440_v21 }
 0x10d   : > { %526 = vst.msk [vmem:[#allocation2 + $0x40] sm:$0xff] %vm517_vm4, %v438_v22 }
 0x10f   : > { %v472_v59 = vpop.permute.xlu1 %471 }
 0x110   : > { %v470_v60 = vpop.permute.xlu0 %469  ;;  %543 = vst.msk [vmem:[#allocation2 + $0xc8] sm:$0xff] %vm517_vm4, %v472_v59 }
 0x111   : > { %542 = vst.msk [vmem:[#allocation2 + $0xc0] sm:$0xff] %vm517_vm4, %v470_v60 }
 0x113   : > { %v569_v61 = vpop.permute.xlu1 %568 }
 0x114   : > { %v567_v62 = vpop.permute.xlu0 %566  ;;  %657 = vst.msk [vmem:[#allocation2 + $0x49] sm:$0x7f] %vm648_vm5, %v569_v61  ;;  %v2085_v61 = vld [vmem:[%s2203_s2] ss:$0 sm:$0xff] }
 0x115   : > { %656 = vst.msk [vmem:[#allocation2 + $0x41] sm:$0xff] %vm646_vm6, %v567_v62 }
 0x117   : > { %v601_v63 = vpop.permute.xlu1 %600 }
 0x118   : > { %v599_v0 = vpop.permute.xlu0 %598  ;;  %673 = vst.msk [vmem:[#allocation2 + $0xc9] sm:$0x7f] %vm648_vm5, %v601_v63 }
 0x119   : > { %672 = vst.msk [vmem:[#allocation2 + $0xc1] sm:$0xff] %vm646_vm6, %v599_v0 }
 0x11b   : > { %v699_v1 = vpop.permute.xlu1 %698 }
 0x11c   : > { %v697_v2 = vpop.permute.xlu0 %696  ;;  %787 = vst.msk [vmem:[#allocation2 + $0x47] sm:$0xff] %vm778_vm7, %v699_v1 }
 0x11d   : > { %786 = vst.msk [vmem:[#allocation2 + $0x3f] sm:$0xfe] %vm776_vm8, %v697_v2 }
 0x11f   : > { %v731_v3 = vpop.permute.xlu1 %730 }
 0x120   : > { %v729_v4 = vpop.permute.xlu0 %728  ;;  %803 = vst.msk [vmem:[#allocation2 + $0xc7] sm:$0xff] %vm778_vm7, %v731_v3 }
 0x121   : > { %802 = vst.msk [vmem:[#allocation2 + $0xbf] sm:$0xfe] %vm776_vm8, %v729_v4 }
 0x123   : > { %v321_v5 = vpop.permute.xlu1 %320  ;;  %v819_v10 = vld [vmem:[#allocation2 + $0x48] sm:$0xff] }
 0x124   : > { %v319_v6 = vpop.permute.xlu0 %318  ;;  %v818_v9 = vld [vmem:[#allocation2 + $0x40] sm:$0xff]  ;;  %400 = vst.msk [vmem:[#allocation2 + $0x58] sm:$0xff] %vm388_vm3, %v321_v5 }
 0x125   : > { %399 = vst.msk [vmem:[#allocation2 + $0x50] sm:$0xff] %vm388_vm3, %v319_v6  ;;  %1365 = vmatprep.mubr.msk.f32.mxu0 %vm203_vm0, %v818_v9 }
 0x126   : > { %1366 = vmatmul.mubr.msk.f32.gmra.mrb[8].mxu0 %vm203_vm0, %v819_v10 }
 0x127   : > { %v353_v11 = vpop.permute.xlu1 %352  ;;  %v835_v14 = vld [vmem:[#allocation2 + $0xc8] sm:$0xff] }
 0x128   : > { %v351_v12 = vpop.permute.xlu0 %350  ;;  %v834_v13 = vld [vmem:[#allocation2 + $0xc0] sm:$0xff]  ;;  %416 = vst.msk [vmem:[#allocation2 + $0xd8] sm:$0xff] %vm388_vm3, %v353_v11 }
 0x129   : > { %415 = vst.msk [vmem:[#allocation2 + $0xd0] sm:$0xff] %vm388_vm3, %v351_v12  ;;  %1389 = vmatprep.mubr.msk.f32.mxu1 %vm203_vm0, %v834_v13 }
 0x12a   : > { %1390 = vmatmul.mubr.msk.f32.gmra.mrb[8].mxu1 %vm203_vm0, %v835_v14 }
 0x12b   : > { %v444_v15 = vpop.permute.xlu1 %443 }
 0x12c   : > { %v442_v16 = vpop.permute.xlu0 %441  ;;  %529 = vst.msk [vmem:[#allocation2 + $0x58] sm:$0xff] %vm517_vm4, %v444_v15 }
 0x12d   : > { %528 = vst.msk [vmem:[#allocation2 + $0x50] sm:$0xff] %vm517_vm4, %v442_v16 }
 0x12f   : > { %v476_v17 = vpop.permute.xlu1 %475 }
 0x130   : > { %v474_v18 = vpop.permute.xlu0 %473  ;;  %545 = vst.msk [vmem:[#allocation2 + $0xd8] sm:$0xff] %vm517_vm4, %v476_v17 }
 0x131   : > { %544 = vst.msk [vmem:[#allocation2 + $0xd0] sm:$0xff] %vm517_vm4, %v474_v18 }
 0x133   : > { %v573_v19 = vpop.permute.xlu1 %572 }
 0x134   : > { %v571_v20 = vpop.permute.xlu0 %570  ;;  %659 = vst.msk [vmem:[#allocation2 + $0x59] sm:$0x7f] %vm648_vm5, %v573_v19 }
 0x135   : > { %658 = vst.msk [vmem:[#allocation2 + $0x51] sm:$0xff] %vm646_vm6, %v571_v20 }
 0x137   : > { %v605_v23 = vpop.permute.xlu1 %604 }
 0x138   : > { %v603_v24 = vpop.permute.xlu0 %602  ;;  %675 = vst.msk [vmem:[#allocation2 + $0xd9] sm:$0x7f] %vm648_vm5, %v605_v23 }
 0x139   : > { %674 = vst.msk [vmem:[#allocation2 + $0xd1] sm:$0xff] %vm646_vm6, %v603_v24 }
 0x13b   : > { %v703_v25 = vpop.permute.xlu1 %702 }
 0x13c   : > { %v701_v27 = vpop.permute.xlu0 %700  ;;  %789 = vst.msk [vmem:[#allocation2 + $0x57] sm:$0xff] %vm778_vm7, %v703_v25 }
 0x13d   : > { %788 = vst.msk [vmem:[#allocation2 + $0x4f] sm:$0xfe] %vm776_vm8, %v701_v27 }
 0x13f   : > { %v735_v26 = vpop.permute.xlu1 %734 }
 0x140   : > { %v733_v28 = vpop.permute.xlu0 %732  ;;  %805 = vst.msk [vmem:[#allocation2 + $0xd7] sm:$0xff] %vm778_vm7, %v735_v26 }
 0x141   : > { %804 = vst.msk [vmem:[#allocation2 + $0xcf] sm:$0xfe] %vm776_vm8, %v733_v28 }
 0x143   : > { %v325_v29 = vpop.permute.xlu1 %324  ;;  %v821_v36 = vld [vmem:[#allocation2 + $0x58] sm:$0xff] }
 0x144   : > { %v323_v30 = vpop.permute.xlu0 %322  ;;  %v820_v35 = vld [vmem:[#allocation2 + $0x50] sm:$0xff]  ;;  %402 = vst.msk [vmem:[#allocation2 + $0x68] sm:$0xff] %vm388_vm3, %v325_v29 }
 0x145   : > { %401 = vst.msk [vmem:[#allocation2 + $0x60] sm:$0xff] %vm388_vm3, %v323_v30  ;;  %1368 = vmatprep.mubr.msk.f32.mxu0 %vm203_vm0, %v820_v35 }
 0x146   : > { %1369 = vmatmul.mubr.msk.f32.gmra.mrb[10].mxu0 %vm203_vm0, %v821_v36 }
 0x147   : > { %v357_v37 = vpop.permute.xlu1 %356  ;;  %v837_v40 = vld [vmem:[#allocation2 + $0xd8] sm:$0xff] }
 0x148   : > { %v355_v38 = vpop.permute.xlu0 %354  ;;  %v836_v39 = vld [vmem:[#allocation2 + $0xd0] sm:$0xff]  ;;  %418 = vst.msk [vmem:[#allocation2 + $0xe8] sm:$0xff] %vm388_vm3, %v357_v37 }
 0x149   : > { %417 = vst.msk [vmem:[#allocation2 + $0xe0] sm:$0xff] %vm388_vm3, %v355_v38  ;;  %1392 = vmatprep.mubr.msk.f32.mxu1 %vm203_vm0, %v836_v39 }
 0x14a   : > { %1393 = vmatmul.mubr.msk.f32.gmra.mrb[10].mxu1 %vm203_vm0, %v837_v40 }
 0x14b   : > { %v448_v41 = vpop.permute.xlu1 %447 }
 0x14c   : > { %v446_v42 = vpop.permute.xlu0 %445  ;;  %531 = vst.msk [vmem:[#allocation2 + $0x68] sm:$0xff] %vm517_vm4, %v448_v41 }
 0x14d   : > { %530 = vst.msk [vmem:[#allocation2 + $0x60] sm:$0xff] %vm517_vm4, %v446_v42 }
 0x14f   : > { %v480_v43 = vpop.permute.xlu1 %479 }
 0x150   : > { %v478_v44 = vpop.permute.xlu0 %477  ;;  %547 = vst.msk [vmem:[#allocation2 + $0xe8] sm:$0xff] %vm517_vm4, %v480_v43 }
 0x151   : > { %546 = vst.msk [vmem:[#allocation2 + $0xe0] sm:$0xff] %vm517_vm4, %v478_v44 }
 0x153   : > { %v577_v45 = vpop.permute.xlu1 %576 }
 0x154   : > { %v575_v46 = vpop.permute.xlu0 %574  ;;  %661 = vst.msk [vmem:[#allocation2 + $0x69] sm:$0x7f] %vm648_vm5, %v577_v45 }
 0x155   : > { %660 = vst.msk [vmem:[#allocation2 + $0x61] sm:$0xff] %vm646_vm6, %v575_v46 }
 0x157   : > { %v609_v47 = vpop.permute.xlu1 %608 }
 0x158   : > { %v607_v48 = vpop.permute.xlu0 %606  ;;  %677 = vst.msk [vmem:[#allocation2 + $0xe9] sm:$0x7f] %vm648_vm5, %v609_v47 }
 0x159   : > { %676 = vst.msk [vmem:[#allocation2 + $0xe1] sm:$0xff] %vm646_vm6, %v607_v48 }
 0x15b   : > { %v707_v31 = vpop.permute.xlu1 %706 }
 0x15c   : > { %v705_v32 = vpop.permute.xlu0 %704  ;;  %791 = vst.msk [vmem:[#allocation2 + $0x67] sm:$0xff] %vm778_vm7, %v707_v31 }
 0x15d   : > { %790 = vst.msk [vmem:[#allocation2 + $0x5f] sm:$0xfe] %vm776_vm8, %v705_v32 }
 0x15f   : > { %v739_v33 = vpop.permute.xlu1 %738 }
 0x160   : > { %v737_v34 = vpop.permute.xlu0 %736  ;;  %807 = vst.msk [vmem:[#allocation2 + $0xe7] sm:$0xff] %vm778_vm7, %v739_v33 }
 0x161   : > { %806 = vst.msk [vmem:[#allocation2 + $0xdf] sm:$0xfe] %vm776_vm8, %v737_v34 }
 0x163   : > { %v329_v7 = vpop.permute.xlu1 %328  ;;  %v823_v50 = vld [vmem:[#allocation2 + $0x68] sm:$0xff] }
 0x164   : > { %v327_v8 = vpop.permute.xlu0 %326  ;;  %v822_v49 = vld [vmem:[#allocation2 + $0x60] sm:$0xff]  ;;  %404 = vst.msk [vmem:[#allocation2 + $0x78] sm:$0xff] %vm388_vm3, %v329_v7 }
 0x165   : > { %403 = vst.msk [vmem:[#allocation2 + $0x70] sm:$0xff] %vm388_vm3, %v327_v8  ;;  %1371 = vmatprep.mubr.msk.f32.mxu0 %vm203_vm0, %v822_v49 }
 0x166   : > { %1372 = vmatmul.mubr.msk.f32.gmra.mrb[12].mxu0 %vm203_vm0, %v823_v50 }
 0x167   : > { %v452_v51 = vpop.permute.xlu1 %451  ;;  %v839_v54 = vld [vmem:[#allocation2 + $0xe8] sm:$0xff] }
 0x168   : > { %v450_v52 = vpop.permute.xlu0 %449  ;;  %v838_v53 = vld [vmem:[#allocation2 + $0xe0] sm:$0xff]  ;;  %533 = vst.msk [vmem:[#allocation2 + $0x78] sm:$0xff] %vm517_vm4, %v452_v51 }
 0x169   : > { %532 = vst.msk [vmem:[#allocation2 + $0x70] sm:$0xff] %vm517_vm4, %v450_v52  ;;  %1395 = vmatprep.mubr.msk.f32.mxu1 %vm203_vm0, %v838_v53 }
 0x16a   : > { %1396 = vmatmul.mubr.msk.f32.gmra.mrb[12].mxu1 %vm203_vm0, %v839_v54 }
 0x16b   : > { %v484_v55 = vpop.permute.xlu1 %483 }
 0x16c   : > { %v482_v56 = vpop.permute.xlu0 %481  ;;  %549 = vst.msk [vmem:[#allocation2 + $0xf8] sm:$0xff] %vm517_vm4, %v484_v55 }
 0x16d   : > { %548 = vst.msk [vmem:[#allocation2 + $0xf0] sm:$0xff] %vm517_vm4, %v482_v56 }
 0x16f   : > { %v581_v57 = vpop.permute.xlu1 %580 }
 0x170   : > { %v579_v58 = vpop.permute.xlu0 %578  ;;  %663 = vst.msk [vmem:[#allocation2 + $0x79] sm:$0x7f] %vm648_vm5, %v581_v57 }
 0x171   : > { %662 = vst.msk [vmem:[#allocation2 + $0x71] sm:$0xff] %vm646_vm6, %v579_v58 }
 0x173   : > { %v613_v21 = vpop.permute.xlu1 %612 }
 0x174   : > { %v611_v22 = vpop.permute.xlu0 %610  ;;  %679 = vst.msk [vmem:[#allocation2 + $0xf9] sm:$0x7f] %vm648_vm5, %v613_v21 }
 0x175   : > { %678 = vst.msk [vmem:[#allocation2 + $0xf1] sm:$0xff] %vm646_vm6, %v611_v22 }
 0x177   : > { %v711_v59 = vpop.permute.xlu1 %710 }
 0x178   : > { %v709_v60 = vpop.permute.xlu0 %708  ;;  %793 = vst.msk [vmem:[#allocation2 + $0x77] sm:$0xff] %vm778_vm7, %v711_v59 }
 0x179   : > { %792 = vst.msk [vmem:[#allocation2 + $0x6f] sm:$0xfe] %vm776_vm8, %v709_v60  ;;  %v1355_v62 = vpop.f32.mrb[0].mxu0 }
 0x17a   : > { %v1024_v63 = vadd.f32 %v1355_v62, %v2085_v61  ;;  %v1018_v0 = vpop.f32.mrb[1].mxu0 }
 0x17b   : > { %v1019_v1 = vadd.f32 %v2085_v61, %v1018_v0  ;;  %v743_v2 = vpop.permute.xlu1 %742 }
 0x17c   : > { %v741_v3 = vpop.permute.xlu0 %740  ;;  %1179 = vst.msk [vmem:[%s2094_s6 + $0x8] sm:$0xff] %vm1177_vm9, %v1024_v63 }
 0x17d   : > { %809 = vst.msk [vmem:[#allocation2 + $0xf7] sm:$0xff] %vm778_vm7, %v743_v2  ;;  %v1379_v4 = vpop.f32.mrb[0].mxu1 }
 0x17e   : > { %808 = vst.msk [vmem:[#allocation2 + $0xef] sm:$0xfe] %vm776_vm8, %v741_v3  ;;  %v1104_v5 = vadd.f32 %v1379_v4, %v2085_v61  ;;  %v1098_v6 = vpop.f32.mrb[1].mxu1 }
 0x17f   : > { %1178 = vst.msk [vmem:[%s2094_s6] sm:$0xff] %vm1177_vm9, %v1019_v1  ;;  %v1099_v9 = vadd.f32 %v2085_v61, %v1098_v6  ;;  %v825_v11 = vld [vmem:[#allocation2 + $0x78] sm:$0xff] }
 0x180   : > { %v824_v10 = vld [vmem:[#allocation2 + $0x70] sm:$0xff]  ;;  %1195 = vst.msk [vmem:[%s2094_s6 + $0x88] sm:$0xff] %vm1177_vm9, %v1104_v5 }
 0x181   : > { %1374 = vmatprep.mubr.msk.f32.mxu0 %vm203_vm0, %v824_v10  ;;  %1194 = vst.msk [vmem:[%s2094_s6 + $0x80] sm:$0xff] %vm1177_vm9, %v1099_v9 }
 0x182   : > { %1375 = vmatmul.mubr.msk.f32.gmra.mrb[14].mxu0 %vm203_vm0, %v825_v11 }
 0x184   : > { %v841_v13 = vld [vmem:[#allocation2 + $0xf8] sm:$0xff] }
 0x185   : > { %v840_v12 = vld [vmem:[#allocation2 + $0xf0] sm:$0xff] }
 0x186   : > { %1398 = vmatprep.mubr.msk.f32.mxu1 %vm203_vm0, %v840_v12 }
 0x187   : > { %1399 = vmatmul.mubr.msk.f32.gmra.mrb[14].mxu1 %vm203_vm0, %v841_v13 }
 0x199   : > { %v1358_v14 = vpop.f32.mrb[2].mxu0 }
 0x19a   : > { %v1034_v15 = vadd.f32 %v1358_v14, %v2085_v61  ;;  %v1028_v16 = vpop.f32.mrb[3].mxu0 }
 0x19b   : > { %v1029_v17 = vadd.f32 %v2085_v61, %v1028_v16 }
 0x19c   : > { %1181 = vst.msk [vmem:[%s2094_s6 + $0x18] sm:$0xff] %vm1177_vm9, %v1034_v15 }
 0x19d   : > { %1180 = vst.msk [vmem:[%s2094_s6 + $0x10] sm:$0xff] %vm1177_vm9, %v1029_v17  ;;  %v1382_v18 = vpop.f32.mrb[2].mxu1 }
 0x19e   : > { %v1114_v19 = vadd.f32 %v1382_v18, %v2085_v61  ;;  %v1108_v20 = vpop.f32.mrb[3].mxu1 }
 0x19f   : > { %v1109_v23 = vadd.f32 %v2085_v61, %v1108_v20 }
 0x1a0   : > { %1197 = vst.msk [vmem:[%s2094_s6 + $0x98] sm:$0xff] %vm1177_vm9, %v1114_v19 }
 0x1a1   : > { %1196 = vst.msk [vmem:[%s2094_s6 + $0x90] sm:$0xff] %vm1177_vm9, %v1109_v23 }
 0x1b9   : > { %v1361_v24 = vpop.f32.mrb[4].mxu0 }
 0x1ba   : > { %v1044_v25 = vadd.f32 %v1361_v24, %v2085_v61  ;;  %v1038_v27 = vpop.f32.mrb[5].mxu0 }
 0x1bb   : > { %v1039_v26 = vadd.f32 %v2085_v61, %v1038_v27 }
 0x1bc   : > { %1183 = vst.msk [vmem:[%s2094_s6 + $0x28] sm:$0xff] %vm1177_vm9, %v1044_v25 }
 0x1bd   : > { %1182 = vst.msk [vmem:[%s2094_s6 + $0x20] sm:$0xff] %vm1177_vm9, %v1039_v26  ;;  %v1385_v28 = vpop.f32.mrb[4].mxu1 }
 0x1be   : > { %v1124_v29 = vadd.f32 %v1385_v28, %v2085_v61  ;;  %v1118_v30 = vpop.f32.mrb[5].mxu1 }
 0x1bf   : > { %v1119_v35 = vadd.f32 %v2085_v61, %v1118_v30 }
 0x1c0   : > { %1199 = vst.msk [vmem:[%s2094_s6 + $0xa8] sm:$0xff] %vm1177_vm9, %v1124_v29 }
 0x1c1   : > { %1198 = vst.msk [vmem:[%s2094_s6 + $0xa0] sm:$0xff] %vm1177_vm9, %v1119_v35 }
 0x1d9   : > { %v1364_v36 = vpop.f32.mrb[6].mxu0 }
 0x1da   : > { %v1054_v37 = vadd.f32 %v1364_v36, %v2085_v61  ;;  %v1048_v38 = vpop.f32.mrb[7].mxu0 }
 0x1db   : > { %v1049_v39 = vadd.f32 %v2085_v61, %v1048_v38 }
 0x1dc   : > { %1185 = vst.msk [vmem:[%s2094_s6 + $0x38] sm:$0xff] %vm1177_vm9, %v1054_v37 }
 0x1dd   : > { %1184 = vst.msk [vmem:[%s2094_s6 + $0x30] sm:$0xff] %vm1177_vm9, %v1049_v39  ;;  %v1388_v40 = vpop.f32.mrb[6].mxu1 }
 0x1de   : > { %v1134_v41 = vadd.f32 %v1388_v40, %v2085_v61  ;;  %v1128_v42 = vpop.f32.mrb[7].mxu1 }
 0x1df   : > { %v1129_v43 = vadd.f32 %v2085_v61, %v1128_v42 }
 0x1e0   : > { %1201 = vst.msk [vmem:[%s2094_s6 + $0xb8] sm:$0xff] %vm1177_vm9, %v1134_v41 }
 0x1e1   : > { %1200 = vst.msk [vmem:[%s2094_s6 + $0xb0] sm:$0xff] %vm1177_vm9, %v1129_v43 }
 0x1f9   : > { %v1367_v44 = vpop.f32.mrb[8].mxu0 }
 0x1fa   : > { %v1064_v45 = vadd.f32 %v1367_v44, %v2085_v61  ;;  %v1058_v46 = vpop.f32.mrb[9].mxu0 }
 0x1fb   : > { %v1059_v47 = vadd.f32 %v2085_v61, %v1058_v46 }
 0x1fc   : > { %1187 = vst.msk [vmem:[%s2094_s6 + $0x48] sm:$0xff] %vm1177_vm9, %v1064_v45 }
 0x1fd   : > { %1186 = vst.msk [vmem:[%s2094_s6 + $0x40] sm:$0xff] %vm1177_vm9, %v1059_v47  ;;  %v1391_v48 = vpop.f32.mrb[8].mxu1 }
 0x1fe   : > { %v1144_v31 = vadd.f32 %v1391_v48, %v2085_v61  ;;  %v1138_v32 = vpop.f32.mrb[9].mxu1 }
 0x1ff   : > { %v1139_v33 = vadd.f32 %v2085_v61, %v1138_v32 }
 0x200   : > { %1203 = vst.msk [vmem:[%s2094_s6 + $0xc8] sm:$0xff] %vm1177_vm9, %v1144_v31 }
 0x201   : > { %1202 = vst.msk [vmem:[%s2094_s6 + $0xc0] sm:$0xff] %vm1177_vm9, %v1139_v33 }
 0x219   : > { %v1370_v34 = vpop.f32.mrb[10].mxu0 }
 0x21a   : > { %v1074_v7 = vadd.f32 %v1370_v34, %v2085_v61  ;;  %v1068_v8 = vpop.f32.mrb[11].mxu0 }
 0x21b   : > { %v1069_v49 = vadd.f32 %v2085_v61, %v1068_v8 }
 0x21c   : > { %1189 = vst.msk [vmem:[%s2094_s6 + $0x58] sm:$0xff] %vm1177_vm9, %v1074_v7 }
 0x21d   : > { %1188 = vst.msk [vmem:[%s2094_s6 + $0x50] sm:$0xff] %vm1177_vm9, %v1069_v49  ;;  %v1394_v50 = vpop.f32.mrb[10].mxu1 }
 0x21e   : > { %v1154_v51 = vadd.f32 %v1394_v50, %v2085_v61  ;;  %v1148_v52 = vpop.f32.mrb[11].mxu1 }
 0x21f   : > { %v1149_v53 = vadd.f32 %v2085_v61, %v1148_v52 }
 0x220   : > { %1205 = vst.msk [vmem:[%s2094_s6 + $0xd8] sm:$0xff] %vm1177_vm9, %v1154_v51 }
 0x221   : > { %1204 = vst.msk [vmem:[%s2094_s6 + $0xd0] sm:$0xff] %vm1177_vm9, %v1149_v53 }
 0x239   : > { %v1373_v54 = vpop.f32.mrb[12].mxu0 }
 0x23a   : > { %v1084_v55 = vadd.f32 %v1373_v54, %v2085_v61  ;;  %v1078_v56 = vpop.f32.mrb[13].mxu0 }
 0x23b   : > { %v1079_v57 = vadd.f32 %v2085_v61, %v1078_v56 }
 0x23c   : > { %1191 = vst.msk [vmem:[%s2094_s6 + $0x68] sm:$0xff] %vm1177_vm9, %v1084_v55 }
 0x23d   : > { %1190 = vst.msk [vmem:[%s2094_s6 + $0x60] sm:$0xff] %vm1177_vm9, %v1079_v57  ;;  %v1397_v58 = vpop.f32.mrb[12].mxu1 }
 0x23e   : > { %v1164_v21 = vadd.f32 %v1397_v58, %v2085_v61  ;;  %v1158_v22 = vpop.f32.mrb[13].mxu1 }
 0x23f   : > { %v1159_v59 = vadd.f32 %v2085_v61, %v1158_v22 }
 0x240   : > { %1207 = vst.msk [vmem:[%s2094_s6 + $0xe8] sm:$0xff] %vm1177_vm9, %v1164_v21 }
 0x241   : > { %1206 = vst.msk [vmem:[%s2094_s6 + $0xe0] sm:$0xff] %vm1177_vm9, %v1159_v59 }
 0x255   : > { %v1376_v60 = vpop.f32.mrb[14].mxu0 }
 0x256   : > { %v1094_v62 = vadd.f32 %v1376_v60, %v2085_v61  ;;  %v1088_v63 = vpop.f32.mrb[15].mxu0 }
 0x257   : > { %v1089_v0 = vadd.f32 %v2085_v61, %v1088_v63 }
 0x258   : > { %1193 = vst.msk [vmem:[%s2094_s6 + $0x78] sm:$0xff] %vm1177_vm9, %v1094_v62 }
 0x259   : > { %1192 = vst.msk [vmem:[%s2094_s6 + $0x70] sm:$0xff] %vm1177_vm9, %v1089_v0 }
 0x25a   : > { %v1400_v1 = vpop.f32.mrb[14].mxu1 }
 0x25b   : > { %v1174_v2 = vadd.f32 %v1400_v1, %v2085_v61  ;;  %v1168_v3 = vpop.f32.mrb[15].mxu1 }
 0x25c   : > { %v1169_v4 = vadd.f32 %v2085_v61, %v1168_v3 }
 0x25d   : > { %1209 = vst.msk [vmem:[%s2094_s6 + $0xf8] sm:$0xff] %vm1177_vm9, %v1174_v2 }
 0x25e   : > { %1208 = vst.msk [vmem:[%s2094_s6 + $0xf0] sm:$0xff] %vm1177_vm9, %v1169_v4 }
 0x25f PF: > { %s13_s12 = sadd.s32 1, %s1428_s12  }
 0x260   : > { %p10_p4 = scmp.ge.s32.totalorder %s13_s12, 4  }
 0x262   :  { %12 = sbr.rel (!%p10_p4) target bundleno = 1 (0x1), region = 63 }

</bundles_post_ra>
